<compile_context>
chip_gen: v7x
topology: tpu7x:2x2x1
jax: 0.10.0
libtpu: 0.0.40
codegen_flags: <defaults>
</compile_context>

<pallas_src>
import math
import functools

import jax
import jax.numpy as jnp
from jax.experimental import pallas as pl
from jax.experimental.pallas import tpu as pltpu

F32 = jnp.float32
BF16 = jnp.bfloat16
LN_EPS = 1e-5                      # PyTorch nn.LayerNorm default


# ---------------------------------------------------------------------------
# Per-generation configuration (VMEM limit + tile caps)
# ---------------------------------------------------------------------------

@functools.lru_cache(maxsize=None)
def _cfg():
    cap = None
    try:
        info = pltpu.get_tpu_info()
        for name in ("vmem_capacity_bytes", "vmem_size_bytes", "vmem_bytes"):
            cap = getattr(info, name, None)
            if cap:
                break
    except Exception:
        cap = None
    if cap is None:
        cap = 64 * 1024 * 1024                       # conservative: assume v7x-sized VMEM
    if cap >= 96 * 1024 * 1024:                      # v5e / v6e: 128 MiB physical VMEM
        return {"vmem_limit": 100 * 1024 * 1024,
                "tm": 512, "tn": 1024, "tk": 1024, "tf": 512}
    # v7x: 64 MiB physical VMEM -> leave headroom, keep tiles modest
    return {"vmem_limit": 48 * 1024 * 1024,
            "tm": 256, "tn": 512, "tk": 512, "tf": 512}


def _mosaic_params(n_grid_axes, semantics=None):
    cfg = _cfg()
    if semantics is None:
        semantics = ("parallel",) * n_grid_axes
    return pltpu.CompilerParams(dimension_semantics=semantics,
                                vmem_limit_bytes=cfg["vmem_limit"])


# ---------------------------------------------------------------------------
# Tile-size helpers
# ---------------------------------------------------------------------------

def _pick_tile(dim, cap):
    """Largest MXU-friendly tile (multiple of 256, else 128) <= cap that divides `dim`.
    Returns `dim` if it already fits under cap, else -1 when no clean divisor exists."""
    if dim <= cap:
        return dim
    for quantum in (256, 128):
        t = (cap // quantum) * quantum
        while t >= quantum:
            if dim % t == 0:
                return t
            t -= quantum
    return -1


def _tile_or_full(dim, cap):
    t = _pick_tile(dim, cap)
    return dim if t <= 0 else t


def _row_plan(dim, cap):
    """(tile, padded_dim) for the row (M = B*S) axis.  Pads to a tile multiple when no
    MXU-friendly divisor exists so a fallback whole-M block can never blow VMEM."""
    t = _pick_tile(dim, cap)
    if t > 0:
        return t, dim
    t = max(128, (cap // 256) * 256)
    return t, ((dim + t - 1) // t) * t


def _pick_divisor(dim, cap):
    t = max(1, min(dim, cap))
    while dim % t:
        t -= 1
    return t


def _embed_row_tile(B, S, target_rows=512):
    """tb sequences per embed grid step; tb*S rows must be 8-aligned or full."""
    tb = max(1, min(B, target_rows // max(S, 1)))
    while tb > 1 and (B % tb or (tb * S) % 8):
        tb -= 1
    if B % tb or (tb * S) % 8:
        tb = B                                        # full-array block is always legal
    return tb


# ---------------------------------------------------------------------------
# Tiled linear kernel with fused epilogues (bias, relu, residual + LayerNorm)
# ---------------------------------------------------------------------------

def _linear_kernel(x_ref, w_ref, b_ref, *rest, act, has_res_ln, eps):
    if has_res_ln:
        res_ref, g_ref, bt_ref, o_ref, acc_ref = rest
    else:
        o_ref, acc_ref = rest

    @pl.when(pl.program_id(2) == 0)
    def _init():
        acc_ref[...] = jnp.zeros_like(acc_ref)

    acc_ref[...] += jnp.dot(x_ref[...], w_ref[...],
                            preferred_element_type=jnp.float32)

    @pl.when(pl.program_id(2) == pl.num_programs(2) - 1)
    def _flush():
        y = acc_ref[...] + b_ref[...]
        if act == "relu":
            y = jnp.maximum(y, 0.0)
        if has_res_ln:
            # post-norm residual: LayerNorm(residual + y), biased variance (torch).
            z = y + res_ref[...].astype(jnp.float32)
            mean = jnp.mean(z, axis=-1, keepdims=True)
            c = z - mean
            var = jnp.mean(c * c, axis=-1, keepdims=True)
            y = c * jax.lax.rsqrt(var + eps) * g_ref[...] + bt_ref[...]
        o_ref[...] = y.astype(o_ref.dtype)


def linear(x, w, b, *, act="none", residual=None, ln=None, out_dtype=BF16):
    """y = act(x @ w + b)  [optionally y = LayerNorm(residual + y)].
    x: (M, K) bf16, w: (K, N) bf16 (stored as torch W.T), b: (N,) f32."""
    cfg = _cfg()
    M, K = x.shape
    N = w.shape[1]
    has_res_ln = residual is not None

    tm, Mp = _row_plan(M, cfg["tm"])
    tk = _tile_or_full(K, cfg["tk"])
    # LayerNorm needs the full feature row resident at flush time -> tn = N.
    tn = N if has_res_ln else _tile_or_full(N, cfg["tn"])

    if Mp != M:                                       # pad awkward row counts
        pad = Mp - M
        x = jnp.pad(x, ((0, pad), (0, 0)))
        if has_res_ln:
            residual = jnp.pad(residual, ((0, pad), (0, 0)))

    grid = (Mp // tm, N // tn, K // tk)
    in_specs = [
        pl.BlockSpec((tm, tk), lambda i, j, k: (i, k)),
        pl.BlockSpec((tk, tn), lambda i, j, k: (k, j)),
        pl.BlockSpec((1, tn), lambda i, j, k: (0, j)),
    ]
    args = [x, w, b.reshape(1, N).astype(F32)]
    if has_res_ln:
        gamma, beta = ln
        in_specs += [
            pl.BlockSpec((tm, tn), lambda i, j, k: (i, j)),
            pl.BlockSpec((1, tn), lambda i, j, k: (0, j)),
            pl.BlockSpec((1, tn), lambda i, j, k: (0, j)),
        ]
        args += [residual, gamma.reshape(1, N).astype(F32),
                 beta.reshape(1, N).astype(F32)]

    out = pl.pallas_call(
        functools.partial(_linear_kernel, act=act, has_res_ln=has_res_ln, eps=LN_EPS),
        grid=grid,
        out_shape=jax.ShapeDtypeStruct((Mp, N), out_dtype),
        in_specs=in_specs,
        out_specs=pl.BlockSpec((tm, tn), lambda i, j, k: (i, j)),
        scratch_shapes=[pltpu.VMEM((tm, tn), jnp.float32)],
        compiler_params=_mosaic_params(3, ("parallel", "parallel", "arbitrary")),
    )(*args)
    return out if Mp == M else out[:M]


# ---------------------------------------------------------------------------
# Fused FFN block: LayerNorm(x + relu(x @ W1 + b1) @ W2 + b2)
# (the (M, dim_ff) intermediate never leaves VMEM)
# ---------------------------------------------------------------------------

def _ffn_kernel(x_ref, w1_ref, b1_ref, w2_ref, b2_ref, g_ref, bt_ref,
                o_ref, acc_ref, *, eps):
    @pl.when(pl.program_id(1) == 0)
    def _init():
        acc_ref[...] = jnp.zeros_like(acc_ref)

    h = jnp.dot(x_ref[...], w1_ref[...], preferred_element_type=jnp.float32)
    h = jnp.maximum(h + b1_ref[...], 0.0)
    acc_ref[...] += jnp.dot(h.astype(x_ref.dtype), w2_ref[...],
                            preferred_element_type=jnp.float32)

    @pl.when(pl.program_id(1) == pl.num_programs(1) - 1)
    def _flush():
        # residual is the same x block that fed the matmul -> no extra input stream.
        z = acc_ref[...] + b2_ref[...] + x_ref[...].astype(jnp.float32)
        mean = jnp.mean(z, axis=-1, keepdims=True)
        c = z - mean
        var = jnp.mean(c * c, axis=-1, keepdims=True)
        y = c * jax.lax.rsqrt(var + eps) * g_ref[...] + bt_ref[...]
        o_ref[...] = y.astype(o_ref.dtype)


def ffn_block(x, w1, b1, w2, b2, ln):
    """x: (M, D) bf16 -> LayerNorm(x + relu(x@w1+b1)@w2 + b2), streamed over dim_ff."""
    cfg = _cfg()
    M, D = x.shape
    FF = w1.shape[1]
    gamma, beta = ln

    tm, Mp = _row_plan(M, cfg["tm"])
    tf = _tile_or_full(FF, cfg["tf"])
    xp = x if Mp == M else jnp.pad(x, ((0, Mp - M), (0, 0)))

    out = pl.pallas_call(
        functools.partial(_ffn_kernel, eps=LN_EPS),
        grid=(Mp // tm, FF // tf),
        out_shape=jax.ShapeDtypeStruct((Mp, D), BF16),
        in_specs=[
            pl.BlockSpec((tm, D), lambda i, f: (i, 0)),   # x resident across f
            pl.BlockSpec((D, tf), lambda i, f: (0, f)),   # W1 chunk
            pl.BlockSpec((1, tf), lambda i, f: (0, f)),   # b1 chunk
            pl.BlockSpec((tf, D), lambda i, f: (f, 0)),   # W2 chunk
            pl.BlockSpec((1, D), lambda i, f: (0, 0)),    # b2
            pl.BlockSpec((1, D), lambda i, f: (0, 0)),    # gamma
            pl.BlockSpec((1, D), lambda i, f: (0, 0)),    # beta
        ],
        out_specs=pl.BlockSpec((tm, D), lambda i, f: (i, 0)),
        scratch_shapes=[pltpu.VMEM((tm, D), jnp.float32)],
        compiler_params=_mosaic_params(2, ("parallel", "arbitrary")),
    )(xp, w1, b1.reshape(1, FF).astype(F32), w2, b2.reshape(1, D).astype(F32),
      gamma.reshape(1, D).astype(F32), beta.reshape(1, D).astype(F32))
    return out if Mp == M else out[:M]


# ---------------------------------------------------------------------------
# Embedding linear fused with scale and positional-encoding add
# ---------------------------------------------------------------------------

def _embed_pe_kernel(x_ref, w_ref, b_ref, pe_ref, o_ref, *, scale):
    y = jnp.dot(x_ref[...], w_ref[...], preferred_element_type=jnp.float32)
    y = (y + b_ref[...]) * scale + pe_ref[...].astype(jnp.float32)
    o_ref[...] = y.astype(o_ref.dtype)


def embed_with_pe(src, w, b, pe, scale):
    """src: (B, S, K) f32 -> (B*S, D) bf16 = (src@W + b)*scale + PE.
    tb sequences per grid step (tb*S-row matmul for MXU fill); bf16 src/PE DMAs."""
    B, S, K = src.shape
    D = w.shape[1]
    tb = _embed_row_tile(B, S)
    tm = tb * S

    x2 = src.astype(BF16).reshape(B * S, K)
    pe_rows = jnp.tile(pe.astype(BF16), (tb, 1))      # (tm, D): tiny, never (B,S,D) in HBM

    return pl.pallas_call(
        functools.partial(_embed_pe_kernel, scale=scale),
        grid=(B // tb,),
        out_shape=jax.ShapeDtypeStruct((B * S, D), BF16),
        in_specs=[
            pl.BlockSpec((tm, K), lambda i: (i, 0)),
            pl.BlockSpec((K, D), lambda i: (0, 0)),    # weights stay resident
            pl.BlockSpec((1, D), lambda i: (0, 0)),
            pl.BlockSpec((tm, D), lambda i: (0, 0)),   # tiled PE, same block every step
        ],
        out_specs=pl.BlockSpec((tm, D), lambda i: (i, 0)),
        compiler_params=_mosaic_params(1),
    )(x2, w, b.reshape(1, D).astype(F32), pe_rows)


# ---------------------------------------------------------------------------
# Fused multi-head self-attention: all heads of one batch element per grid step
# ---------------------------------------------------------------------------

def _mha_kernel(qkv_ref, o_ref, *, nhead, scale):
    # TODO(synk): for long sequences this materializes (S,S) scores per head; switch to
    #             a flash-style KV-tiled inner loop (budgeted against v7x's 64 MiB VMEM).
    D = qkv_ref.shape[2] // 3
    dh = D // nhead
    for h in range(nhead):                               # static unroll over heads
        # Ref-level static slices: per-head q/k/v loaded directly from VMEM — the full
        # (S, 3D) slab is never materialized in vregs and no concatenate is needed.
        # The 1/sqrt(dh) scale is folded into q ((S,dh) muls, not (S,S)).
        qh = (qkv_ref[0, :, h * dh:(h + 1) * dh].astype(jnp.float32)
              * scale).astype(BF16)
        kh = qkv_ref[0, :, D + h * dh:D + (h + 1) * dh]
        vh = qkv_ref[0, :, 2 * D + h * dh:2 * D + (h + 1) * dh]
        # Q @ K^T without materializing a transpose (contract last dims on the MXU).
        s = jax.lax.dot_general(qh, kh, (((1,), (1,)), ((), ())),
                                preferred_element_type=jnp.float32)
        m = jnp.max(s, axis=-1, keepdims=True)
        p = jnp.exp(s - m)
        denom = jnp.sum(p, axis=-1, keepdims=True)
        p = p * pl.reciprocal(denom, approx=True)        # divide on the EUP slot
        ctx = jnp.dot(p.astype(vh.dtype), vh, preferred_element_type=jnp.float32)
        # write this head's context straight into its output slice (lane-dense (S, D)).
        o_ref[0, :, h * dh:(h + 1) * dh] = ctx.astype(o_ref.dtype)


def mha_attention(qkv, nhead, scale):
    """qkv: (B, S, 3D) bf16 -> context (B, S, D) bf16; one grid step per batch element."""
    B, S, D3 = qkv.shape
    D = D3 // 3
    return pl.pallas_call(
        functools.partial(_mha_kernel, nhead=nhead, scale=scale),
        grid=(B,),
        out_shape=jax.ShapeDtypeStruct((B, S, D), BF16),
        in_specs=[pl.BlockSpec((1, S, D3), lambda i: (i, 0, 0))],
        out_specs=pl.BlockSpec((1, S, D), lambda i: (i, 0, 0)),
        compiler_params=_mosaic_params(1),
    )(qkv)


# ---------------------------------------------------------------------------
# Fused mean-pool (over seq) + 2-layer MLP head
# ---------------------------------------------------------------------------

def _head_kernel(x_ref, w1_ref, b1_ref, w2_ref, b2_ref, o_ref):
    pooled = jnp.mean(x_ref[...].astype(jnp.float32), axis=1)        # (tb, D)
    h = jnp.dot(pooled.astype(jnp.bfloat16), w1_ref[...],
                preferred_element_type=jnp.float32) + b1_ref[...]
    h = jnp.maximum(h, 0.0)
    y = jnp.dot(h.astype(jnp.bfloat16), w2_ref[...],
                preferred_element_type=jnp.float32) + b2_ref[...]
    o_ref[...] = y.astype(o_ref.dtype)


def pooled_mlp_head(x, w1, b1, w2, b2):
    B, S, D = x.shape
    Hd = w1.shape[1]
    C = w2.shape[1]
    tb = _pick_divisor(B, 256)
    return pl.pallas_call(
        _head_kernel,
        grid=(B // tb,),
        out_shape=jax.ShapeDtypeStruct((B, C), F32),
        in_specs=[
            pl.BlockSpec((tb, S, D), lambda i: (i, 0, 0)),
            pl.BlockSpec((D, Hd), lambda i: (0, 0)),
            pl.BlockSpec((1, Hd), lambda i: (0, 0)),
            pl.BlockSpec((Hd, C), lambda i: (0, 0)),
            pl.BlockSpec((1, C), lambda i: (0, 0)),
        ],
        out_specs=pl.BlockSpec((tb, C), lambda i: (i, 0)),
        compiler_params=_mosaic_params(1),
    )(x, w1, b1.reshape(1, Hd).astype(F32), w2, b2.reshape(1, C).astype(F32))


# ---------------------------------------------------------------------------
# Parameters (deterministic synthetic init, torch-Linear-like shapes; weights bf16)
# ---------------------------------------------------------------------------

def _dense(key, fan_in, fan_out):
    kw, kb = jax.random.split(key)
    bound = 1.0 / math.sqrt(fan_in)
    w = jax.random.uniform(kw, (fan_in, fan_out), F32, -bound, bound).astype(BF16)  # W.T
    b = jax.random.uniform(kb, (fan_out,), F32, -bound, bound)
    return w, b


def init_params(key, input_dim, model_dim, nhead, num_layers, hidden_dim,
                num_classes, dim_ff=2048):
    del nhead
    keys = jax.random.split(key, 3 + num_layers)
    params = {"embed": _dense(keys[0], input_dim, model_dim), "layers": []}
    for l in range(num_layers):
        ks = jax.random.split(keys[1 + l], 4)
        params["layers"].append({
            "in_proj": _dense(ks[0], model_dim, 3 * model_dim),
            "out_proj": _dense(ks[1], model_dim, model_dim),
            "lin1": _dense(ks[2], model_dim, dim_ff),
            "lin2": _dense(ks[3], dim_ff, model_dim),
            "ln1": (jnp.ones((model_dim,), F32), jnp.zeros((model_dim,), F32)),
            "ln2": (jnp.ones((model_dim,), F32), jnp.zeros((model_dim,), F32)),
        })
    params["mlp1"] = _dense(keys[1 + num_layers], model_dim, hidden_dim)
    params["mlp2"] = _dense(keys[2 + num_layers], hidden_dim, num_classes)
    return params


def positional_encoding(seq_len, d_model):
    # assumes even d_model (same constraint as the torch reference)
    position = jnp.arange(seq_len, dtype=F32)[:, None]
    div_term = jnp.exp(jnp.arange(0, d_model, 2, dtype=F32) * (-math.log(10000.0) / d_model))
    pe = jnp.zeros((seq_len, d_model), F32)
    pe = pe.at[:, 0::2].set(jnp.sin(position * div_term))
    pe = pe.at[:, 1::2].set(jnp.cos(position * div_term))
    return pe  # (S, D)


# ---------------------------------------------------------------------------
# Forward pass (key_padding_mask=None, need_mlp=True; dropout is eval-mode identity)
# ---------------------------------------------------------------------------

def transformer_classifier_forward(params, src, *, nhead):
    # TODO(synk): key_padding_mask path (masked attention + masked mean) not implemented;
    #             forward reproduces the mask=None / need_mlp=True branch.
    B, S, input_dim = src.shape
    we, be = params["embed"]
    D = we.shape[1]
    dh = D // nhead

    # src = embedding(src) * sqrt(input_dim) + PE  (the scale uses the ORIGINAL last dim:
    # `math.sqrt(src.size(-1))` is evaluated before the assignment in the torch one-liner)
    pe = positional_encoding(S, D)
    x2 = embed_with_pe(src, we, be, pe, math.sqrt(input_dim))          # (B*S, D) bf16

    for layer in params["layers"]:
        # --- self-attention block (post-norm) ---
        w_in, b_in = layer["in_proj"]
        qkv = linear(x2, w_in, b_in)                                   # (B*S, 3D)
        ctx = mha_attention(qkv.reshape(B, S, 3 * D), nhead, 1.0 / math.sqrt(dh))
        wo, bo = layer["out_proj"]
        x2 = linear(ctx.reshape(B * S, D), wo, bo,
                    residual=x2, ln=layer["ln1"])                      # out_proj+add+LN fused

        # --- feed-forward block (post-norm), fully fused: lin1+relu+lin2+add+LN ---
        w1, b1 = layer["lin1"]
        w2, b2 = layer["lin2"]
        x2 = ffn_block(x2, w1, b1, w2, b2, layer["ln2"])

    x = x2.reshape(B, S, D)
    wm1, bm1 = params["mlp1"]
    wm2, bm2 = params["mlp2"]
    return pooled_mlp_head(x, wm1, bm1, wm2, bm2)                      # (B, num_classes) f32


# ---------------------------------------------------------------------------

if __name__ == "__main__":
    INPUT_DIM = 16
    MODEL_DIM = 32
    NHEAD = 4
    NUM_LAYERS = 2
    HIDDEN_DIM = 32
    NUM_CLASSES = 4
    BATCH = 2
    SEQ = 8

    key = jax.random.PRNGKey(0)
    k_param, k_data = jax.random.split(key)
    params = init_params(k_param, INPUT_DIM, MODEL_DIM, NHEAD, NUM_LAYERS,
                         HIDDEN_DIM, NUM_CLASSES)
    src = jax.random.normal(k_data, (BATCH, SEQ, INPUT_DIM), F32)

    out = transformer_classifier_forward(params, src, nhead=NHEAD)
    out = jax.block_until_ready(out)
    assert out.shape == (BATCH, NUM_CLASSES) and out.dtype == F32
    assert bool(jnp.all(jnp.isfinite(out)))
    print("KERNEL_OK")
</pallas_src>

<mosaic_0001>
module attributes {stable_mosaic.version = 11 : i64} {
  func.func @_embed_pe_kernel(%arg0: i32, %arg1: memref<16x16xbf16, #tpu.memory_space<vmem>>, %arg2: memref<16x32xbf16, #tpu.memory_space<vmem>>, %arg3: memref<1x32xf32, #tpu.memory_space<vmem>>, %arg4: memref<16x32xbf16, #tpu.memory_space<vmem>>, %arg5: memref<16x32xbf16, #tpu.memory_space<vmem>>) attributes {dimension_semantics = [#tpu.dimension_semantics<parallel>], iteration_bounds = array<i64: 1>, scalar_prefetch = 0 : i64, scratch_operands = 0 : i64, tpu.core_type = #tpu.core_type<tc>, window_params = [{transform_indices = @transform_0, window_bounds = array<i64: 16, 16>}, {pipeline_mode = #tpu.pipeline_mode<synchronous>, transform_indices = @transform_1, window_bounds = array<i64: 16, 32>}, {pipeline_mode = #tpu.pipeline_mode<synchronous>, transform_indices = @transform_2, window_bounds = array<i64: 1, 32>}, {pipeline_mode = #tpu.pipeline_mode<synchronous>, transform_indices = @transform_3, window_bounds = array<i64: 16, 32>}, {transform_indices = @transform_4, window_bounds = array<i64: 16, 32>}]} {
    %c0 = arith.constant 0 : index
    %c0_0 = arith.constant 0 : index
    %0 = vector.load %arg1[%c0, %c0_0] : memref<16x16xbf16, #tpu.memory_space<vmem>>, vector<16x16xbf16>
    %c0_1 = arith.constant 0 : index
    %c0_2 = arith.constant 0 : index
    %1 = vector.load %arg2[%c0_1, %c0_2] : memref<16x32xbf16, #tpu.memory_space<vmem>>, vector<16x32xbf16>
    %cst = arith.constant dense<0.000000e+00> : vector<16x32xf32>
    %2 = tpu.matmul %0, %1, %cst {dimension_numbers = #tpu.dot_dimension_numbers<[1], [0], [0], [1], [0, 0, 1, 1], [], []>} : vector<16x16xbf16>, vector<16x32xbf16>, vector<16x32xf32> -> vector<16x32xf32>
    %c0_3 = arith.constant 0 : index
    %c0_4 = arith.constant 0 : index
    %3 = vector.load %arg3[%c0_3, %c0_4] : memref<1x32xf32, #tpu.memory_space<vmem>>, vector<1x32xf32>
    %4 = vector.broadcast %3 : vector<1x32xf32> to vector<16x32xf32>
    %5 = arith.addf %2, %4 : vector<16x32xf32>
    %cst_5 = arith.constant 4.000000e+00 : f32
    %6 = vector.broadcast %cst_5 : f32 to vector<16x32xf32>
    %7 = arith.mulf %5, %6 : vector<16x32xf32>
    %c0_6 = arith.constant 0 : index
    %c0_7 = arith.constant 0 : index
    %8 = vector.load %arg4[%c0_6, %c0_7] : memref<16x32xbf16, #tpu.memory_space<vmem>>, vector<16x32xbf16>
    %9 = arith.extf %8 : vector<16x32xbf16> to vector<16x32xf32>
    %10 = arith.addf %7, %9 : vector<16x32xf32>
    %11 = arith.truncf %10 : vector<16x32xf32> to vector<16x32xbf16>
    %c0_8 = arith.constant 0 : index
    %c0_9 = arith.constant 0 : index
    %12 = vector.load %arg5[%c0_8, %c0_9] : memref<16x32xbf16, #tpu.memory_space<vmem>>, vector<16x32xbf16>
    tpu.vector_store %arg5[%c0_8, %c0_9], %11 {strides = array<i32>} : memref<16x32xbf16, #tpu.memory_space<vmem>>, vector<16x32xbf16>,
    return
  }
  func.func @transform_0(%arg0: i32) -> (i32, i32) {
    %c0_i32 = arith.constant 0 : i32
    %c0_i32_0 = arith.constant 0 : i32
    return %arg0, %c0_i32 : i32, i32
  }
  func.func @transform_1(%arg0: i32) -> (i32, i32) {
    %c0_i32 = arith.constant 0 : i32
    %c0_i32_0 = arith.constant 0 : i32
    %c0_i32_1 = arith.constant 0 : i32
    return %c0_i32, %c0_i32_0 : i32, i32
  }
  func.func @transform_2(%arg0: i32) -> (i32, i32) {
    %c0_i32 = arith.constant 0 : i32
    %c0_i32_0 = arith.constant 0 : i32
    %c0_i32_1 = arith.constant 0 : i32
    return %c0_i32, %c0_i32_0 : i32, i32
  }
  func.func @transform_3(%arg0: i32) -> (i32, i32) {
    %c0_i32 = arith.constant 0 : i32
    %c0_i32_0 = arith.constant 0 : i32
    %c0_i32_1 = arith.constant 0 : i32
    return %c0_i32, %c0_i32_0 : i32, i32
  }
  func.func @transform_4(%arg0: i32) -> (i32, i32) {
    %c0_i32 = arith.constant 0 : i32
    %c0_i32_0 = arith.constant 0 : i32
    return %arg0, %c0_i32 : i32, i32
  }
}

</mosaic_0001>

<bundles_post_ra>
// kernel: tpu_custom_call.1
= control target key start
LH: loop header
LB: loop body
LE: loop exit
PB: predicated region body
PF: predicated region fallthrough
CT: control target
= control target key end

     0   :  { %9 = vsyncpa [#allocation3], 0  ;;  %s335_s0 = inlined_call_operand.hbm [shape: bf16[16,16], index: 0, kind: input, shape index: {}]   ;;  %s336_s1 = inlined_call_operand.hbm [shape: bf16[16,32], index: 1, kind: input, shape index: {}]   ;;  %s337_s2 = inlined_call_operand.vmem [shape: f32[1,32], index: 2, kind: input, shape index: {}]   ;;  %s338_s3 = inlined_call_operand.vmem [shape: bf16[16,32], index: 3, kind: input, shape index: {}]   ;;  %s339_s4 = inlined_call_operand.hbm [shape: bf16[16,32], index: 4, kind: output, shape index: {}]  }
   0x1   :  { %10 = vsyncpa [#allocation6], 0 }
   0x2   :  { %11 = vsyncpa [#allocation4], 0  ;;  %s252_s15 = smov [#allocation2]   ;;  %s180_s19 = scalar_lea.hbm %s335_s0, 128 }
   0x3   :  { %s17_s16 = sshll.u32 %s252_s15, 4  ;;  %p181_p0 = scmp.ne.s32.totalorder %s335_s0, %s180_s19  ;;  %s18_s16 = int_to_ptr.vmem [resolvable:$true] %s17_s16 }
   0x4   :  { %p184_p1 = scmp.lt.u32.totalorder %s180_s19, %s335_s0 }
   0x6   :  { %p186_p2 = pnand %p184_p1, %p181_p0 }
   0x8   :  { %189 = shalt.err (!%p186_p2)
}
   0x9   :  { %s190_s24 = scalar_lea.vmem %s18_s16, 128  ;;  %p195_p4 = scmp.lt.s32.totalorder %s18_s16, %s18_s16 }
   0xa   :  { %p191_p3 = scmp.ne.s32.totalorder %s18_s16, %s190_s24  ;;  %p196_p5 = scmp.lt.s32.totalorder %s190_s24, %s190_s24 }
   0xc   :  { %p197_p6 = por %p196_p5, %p195_p4 }
   0xe   :  { %p198_p7 = pnand %p197_p6, %p191_p3 }
  0x10   :  { %201 = shalt.err (!%p198_p7)
}
  0x11   :  { %s253_s25 = smov 64   ;;  %s254_s26 = smov 4  }
  0x12   :  { %23 = dma.hbm_to_vmem [thread:$0]  %s335_s0, 128, %s18_s16, [#allocation3], %s253_s25, %s253_s25, %s254_s26  }
  0x13   :  { %s255_s29 = smov [#allocation5]   ;;  %s202_s7 = scalar_lea.hbm %s336_s1, 128 }
  0x14   :  { %s29_s30 = sshll.u32 %s255_s29, 4  ;;  %p203_p8 = scmp.ne.s32.totalorder %s336_s1, %s202_s7  ;;  %s30_s30 = int_to_ptr.vmem [resolvable:$true] %s29_s30 }
  0x15   :  { %p206_p9 = scmp.lt.u32.totalorder %s202_s7, %s336_s1 }
  0x17   :  { %p208_p10 = pnand %p206_p9, %p203_p8 }
  0x19   :  { %211 = shalt.err (!%p208_p10)
}
  0x1a   :  { %s212_s12 = scalar_lea.vmem %s30_s30, 128  ;;  %p217_p12 = scmp.lt.s32.totalorder %s30_s30, %s30_s30 }
  0x1b   :  { %p213_p11 = scmp.ne.s32.totalorder %s30_s30, %s212_s12  ;;  %p218_p13 = scmp.lt.s32.totalorder %s212_s12, %s212_s12 }
  0x1d   :  { %p219_p0 = por %p218_p13, %p217_p12 }
  0x1f   :  { %p220_p1 = pnand %p219_p0, %p213_p11 }
  0x21   :  { %223 = shalt.err (!%p220_p1)
}
  0x22   :  { %35 = dma.hbm_to_vmem [thread:$0]  %s336_s1, 128, %s30_s30, [#allocation6], %s253_s25, %s253_s25, %s254_s26  }
  0x23   :  { %246 = dma.done.wait [#allocation3], 128  }
  0x24   :  { %247 = vsyncadd [#allocation3], 4294967168 }
  0x25   :  { %248 = dma.done.wait [#allocation6], 128  }
  0x26   :  { %249 = vsyncadd [#allocation6], 4294967168  ;;  %v256_v0 = vmov 0.0   ;;  %vm257_vm0 = vmmov 0   ;;  %v178_v1 = vld [vmem:[#allocation5] sm:$0xff]   ;;  %v179_v2 = vld [vmem:[#allocation2] sm:$0xff]  }
  0x27   :  { %165 = vmatprep.subr.bf16.mxu0 %v256_v0  ;;  %167 = vmatprep.mubr.msk.bf16.mxu0 %vm257_vm0, %v256_v0  ;;  %vm69_vm1 = vcmask 130048   ;;  %v151_v3 = vld [vmem:[%s337_s2] ss:$0 sm:$0xff]  ;;  %vm130_vm2 = vcmask 257024   ;;  %s258_s1 = smov [#allocation7]  }
  0x28   :  { %166 = vmatpush3.bf16.msra.mxu0 %v178_v1  ;;  %v160_v4 = vld [vmem:[%s338_s3] sm:$0xff]   ;;  %s138_s18 = sshll.u32 %s258_s1, 4  ;;  %s139_s18 = int_to_ptr.vmem [resolvable:$true] %s138_s18 }
  0x29   :  { %v161_v7 = vunpack.c.l.bf16 %v160_v4  ;;  %v162_v12 = vunpack.c.h.bf16 %v160_v4  ;;  %s224_s2 = scalar_lea.vmem %s139_s18, 128  ;;  %p229_p3 = scmp.lt.s32.totalorder %s139_s18, %s139_s18 }
  0x2a   :  { %p225_p2 = scmp.ne.s32.totalorder %s139_s18, %s224_s2  ;;  %p230_p4 = scmp.lt.s32.totalorder %s224_s2, %s224_s2 }
  0x2b   :  { %168 = vmatmul.mubr.msk.bf16.vlgmr.msra.gmra.mrb[0].mxu0 %vm69_vm1, %v179_v2 }
  0x2c   :  { %p231_p5 = por %p230_p4, %p229_p3 }
  0x2e   :  { %p232_p6 = pnand %p231_p5, %p225_p2 }
  0xfe   :  { %v107_v5 = vpop.f32.mrb[0].mxu0 }
  0xff   :  { %v108_v6 = vadd.f32 %v151_v3, %v107_v5  ;;  %v169_v8 = vpop.f32.mrb[1].mxu0 }
 0x100   :  { %v110_v9 = vpop.f32.mrb[2].mxu0 }
 0x101   :  { %v114_v10 = vmul.f32 4.0, %v108_v6  ;;  %v111_v11 = vadd.f32 %v151_v3, %v110_v9  ;;  %v170_v13 = vpop.f32.mrb[3].mxu0 }
 0x103   :  { %v120_v14 = vadd.f32 %v161_v7, %v114_v10  ;;  %v115_v15 = vmul.f32 4.0, %v111_v11 }
 0x105   :  { %v157_v16 = vpack.c.bf16 %v120_v14, %v120_v14  ;;  %v121_v17 = vadd.f32 %v162_v12, %v115_v15 }
 0x107   :  { %v158_v18 = vpack.c.bf16 %v121_v17, %v121_v17  ;;  %131 = vst.msk [vmem:[#allocation7] sm:$0xf] %vm130_vm2, %v157_v16 }
 0x109   :  { %132 = vst.msk [vmem:[#allocation7 + $0x4] sm:$0xf] %vm130_vm2, %v158_v18 }
 0x10a   :  { %235 = shalt.err (!%p232_p6)
}
 0x10b   :  { %s236_s20 = scalar_lea.hbm %s339_s4, 128 }
 0x10c   :  { %p237_p7 = scmp.ne.s32.totalorder %s339_s4, %s236_s20  ;;  %p240_p8 = scmp.lt.u32.totalorder %s236_s20, %s339_s4 }
 0x10e   :  { %p242_p9 = pnand %p240_p8, %p237_p7 }
 0x110   :  { %245 = shalt.err (!%p242_p9)
}
 0x111   :  { %144 = dma.vmem_to_hbm [thread:$0]  %s139_s18, 128, %s339_s4, [#allocation4], %s253_s25, %s253_s25, %s254_s26  }
 0x112   :  { %250 = dma.done.wait [#allocation4], 128  }
 0x113   :  { %251 = vsyncadd [#allocation4], 4294967168 }
 0x114   :  { %148 = vsyncpa [#allocation3], 1 }
 0x115   :  { %149 = vsyncpa [#allocation6], 1 }
 0x116   :  { %150 = vsyncpa [#allocation4], 1 }

</bundles_post_ra>
